<compile_context>
chip_gen: v7x
topology: tpu7x:2x2x1
jax: 0.10.0
libtpu: 0.0.40
codegen_flags: <defaults>
</compile_context>

<pallas_src>
import functools

import jax
import jax.numpy as jnp
import numpy as np
from jax.experimental import pallas as pl
from jax.experimental.pallas import tpu as pltpu


def _round_up(x, m):
    return (x + m - 1) // m * m


# ---------------------------------------------------------------------------
# Kernels
# ---------------------------------------------------------------------------
def encode_kernel(x_ref, w1_ref, b1_ref, war_ref, bar_ref, z_ref):
    # Hidden layer: Linear -> ReLU (dropout p=0.0 is identity).
    h = jnp.dot(x_ref[...], w1_ref[...], preferred_element_type=jnp.float32)
    h = jnp.maximum(h + b1_ref[...], 0.0)
    # Fused attract|repel projection: one MXU matmul, one [tile_n, da+dr] store.
    z_ref[...] = (
        jnp.dot(h, war_ref[...], preferred_element_type=jnp.float32) + bar_ref[...]
    )


def decode_kernel(zt_ref, row_ref, col_ref, out_ref, *, attract_dim):
    # zt: [dz, n] resident embedding table (edges will land on the lane axis).
    zt = zt_ref[...]
    dz, n = zt.shape
    te = row_ref.shape[1]

    # In-kernel gather via one-hot matmul (MXU is otherwise idle here).
    node_ids = jax.lax.broadcasted_iota(jnp.int32, (n, te), 0)
    onehot_r = (node_ids == row_ref[...]).astype(zt.dtype)          # [n, te]
    onehot_c = (node_ids == col_ref[...]).astype(zt.dtype)          # [n, te]
    g_r = jnp.dot(zt, onehot_r, preferred_element_type=jnp.float32)  # [dz, te]
    g_c = jnp.dot(zt, onehot_c, preferred_element_type=jnp.float32)  # [dz, te]

    # Signed reduction: +1 on attract dims, -1 on repel dims.
    sign = jnp.where(
        jax.lax.broadcasted_iota(jnp.int32, (dz, 1), 0) < attract_dim, 1.0, -1.0
    ).astype(jnp.float32)
    score = jnp.sum(g_r * g_c * sign, axis=0, keepdims=True)         # [1, te]
    out_ref[...] = jax.nn.sigmoid(score)                             # lane-dense store


# ---------------------------------------------------------------------------
# Wrappers
# ---------------------------------------------------------------------------
def encode(x, w1, b1, w_ar, b_ar, *, tile_n=512):
    n, cin = x.shape
    hid = w1.shape[1]
    dz = w_ar.shape[1]

    tile_n = min(tile_n, _round_up(n, 8))     # single step for small n
    n_pad = _round_up(n, tile_n)
    if n_pad != n:
        x = jnp.pad(x, ((0, n_pad - n), (0, 0)))

    z = pl.pallas_call(
        encode_kernel,
        out_shape=jax.ShapeDtypeStruct((n_pad, dz), jnp.float32),
        grid=(n_pad // tile_n,),
        in_specs=[
            pl.BlockSpec((tile_n, cin), lambda i: (i, 0)),
            pl.BlockSpec((cin, hid), lambda i: (0, 0)),
            pl.BlockSpec((1, hid), lambda i: (0, 0)),
            pl.BlockSpec((hid, dz), lambda i: (0, 0)),
            pl.BlockSpec((1, dz), lambda i: (0, 0)),
        ],
        out_specs=pl.BlockSpec((tile_n, dz), lambda i: (i, 0)),
        compiler_params=pltpu.CompilerParams(dimension_semantics=("parallel",)),
    )(x, w1, b1, w_ar, b_ar)
    return z[:n]


def decode(z, edge_index, attract_dim, *, tile_e=2048):
    n, dz = z.shape
    e = edge_index.shape[1]

    tile_e = min(tile_e, _round_up(e, 128))   # lane-dense blocks, single step if small
    e_pad = _round_up(e, tile_e)

    row = edge_index[0].astype(jnp.int32)
    col = edge_index[1].astype(jnp.int32)
    if e_pad != e:
        row = jnp.pad(row, (0, e_pad - e))    # padded edges gather node 0; sliced off below
        col = jnp.pad(col, (0, e_pad - e))
    row = row[None, :]
    col = col[None, :]

    # Layout glue only: transpose the tiny table so edges sit on the lane axis.
    z_t = z.T                                  # [dz, n]

    kernel = functools.partial(decode_kernel, attract_dim=attract_dim)
    scores = pl.pallas_call(
        kernel,
        out_shape=jax.ShapeDtypeStruct((1, e_pad), jnp.float32),
        grid=(e_pad // tile_e,),
        in_specs=[
            pl.BlockSpec((dz, n), lambda i: (0, 0)),      # VMEM-resident table
            pl.BlockSpec((1, tile_e), lambda i: (0, i)),  # row indices
            pl.BlockSpec((1, tile_e), lambda i: (0, i)),  # col indices
        ],
        out_specs=pl.BlockSpec((1, tile_e), lambda i: (0, i)),
        compiler_params=pltpu.CompilerParams(dimension_semantics=("parallel",)),
    )(z_t, row, col)
    return scores[0, :e]


def ar_link_predictor_forward(x, edge_index, params):
    w1, b1, wa, ba, wr, br = params
    # Fuse attract|repel projections into one [hid, da+dr] weight (one-time glue).
    w_ar = jnp.concatenate([wa, wr], axis=1)
    b_ar = jnp.concatenate([ba, br], axis=1)
    attract_dim = wa.shape[1]
    z = encode(x, w1, b1, w_ar, b_ar)
    return decode(z, edge_index, attract_dim)


# ---------------------------------------------------------------------------
# Deterministic parameter init (PyTorch-Linear-style uniform bounds)
# ---------------------------------------------------------------------------
def init_params(key, in_channels, hidden_channels, attract_dim, repel_dim):
    def linear(key, fan_in, fan_out):
        kw, kb = jax.random.split(key)
        bound = 1.0 / np.sqrt(fan_in)
        w = jax.random.uniform(kw, (fan_in, fan_out), jnp.float32, -bound, bound)
        b = jax.random.uniform(kb, (1, fan_out), jnp.float32, -bound, bound)
        return w, b

    k1, k2, k3 = jax.random.split(key, 3)
    w1, b1 = linear(k1, in_channels, hidden_channels)
    wa, ba = linear(k2, hidden_channels, attract_dim)
    wr, br = linear(k3, hidden_channels, repel_dim)
    return (w1, b1, wa, ba, wr, br)


# ---------------------------------------------------------------------------
# Pure-JAX reference for correctness check
# ---------------------------------------------------------------------------
def reference_forward(x, edge_index, params):
    w1, b1, wa, ba, wr, br = params
    h = jnp.maximum(x @ w1 + b1, 0.0)
    attract_z = h @ wa + ba
    repel_z = h @ wr + br
    row, col = edge_index[0], edge_index[1]
    attract_score = jnp.sum(attract_z[row] * attract_z[col], axis=1)
    repel_score = jnp.sum(repel_z[row] * repel_z[col], axis=1)
    return jax.nn.sigmoid(attract_score - repel_score)


if __name__ == "__main__":
    # Small shapes consistent with the module.
    num_nodes = 64
    in_channels = 16
    hidden_channels = 32
    out_channels = 32          # defaults to hidden_channels
    attract_ratio = 0.5
    attract_dim = int(out_channels * attract_ratio)    # 16
    repel_dim = out_channels - attract_dim              # 16
    num_edges = 128

    key = jax.random.PRNGKey(0)
    kx, ke, kp = jax.random.split(key, 3)

    x = jax.random.normal(kx, (num_nodes, in_channels), jnp.float32)
    edge_index = jax.random.randint(ke, (2, num_edges), 0, num_nodes, jnp.int32)
    params = init_params(kp, in_channels, hidden_channels, attract_dim, repel_dim)

    scores = ar_link_predictor_forward(x, edge_index, params)
    scores = jax.block_until_ready(scores)

    ref = reference_forward(x, edge_index, params)
    np.testing.assert_allclose(np.asarray(scores), np.asarray(ref),
                               rtol=1e-5, atol=1e-5)
    assert scores.shape == (num_edges,)
    print("KERNEL_OK")
</pallas_src>

<mosaic_0001>
module attributes {stable_mosaic.version = 11 : i64} {
  func.func @encode_kernel(%arg0: i32, %arg1: memref<64x16xf32, #tpu.memory_space<vmem>>, %arg2: memref<16x32xf32, #tpu.memory_space<vmem>>, %arg3: memref<1x32xf32, #tpu.memory_space<vmem>>, %arg4: memref<32x32xf32, #tpu.memory_space<vmem>>, %arg5: memref<1x32xf32, #tpu.memory_space<vmem>>, %arg6: memref<64x32xf32, #tpu.memory_space<vmem>>) attributes {dimension_semantics = [#tpu.dimension_semantics<parallel>], iteration_bounds = array<i64: 1>, scalar_prefetch = 0 : i64, scratch_operands = 0 : i64, tpu.core_type = #tpu.core_type<tc>, window_params = [{transform_indices = @transform_0, window_bounds = array<i64: 64, 16>}, {pipeline_mode = #tpu.pipeline_mode<synchronous>, transform_indices = @transform_1, window_bounds = array<i64: 16, 32>}, {pipeline_mode = #tpu.pipeline_mode<synchronous>, transform_indices = @transform_2, window_bounds = array<i64: 1, 32>}, {pipeline_mode = #tpu.pipeline_mode<synchronous>, transform_indices = @transform_3, window_bounds = array<i64: 32, 32>}, {pipeline_mode = #tpu.pipeline_mode<synchronous>, transform_indices = @transform_4, window_bounds = array<i64: 1, 32>}, {transform_indices = @transform_5, window_bounds = array<i64: 64, 32>}]} {
    %c0 = arith.constant 0 : index
    %c0_0 = arith.constant 0 : index
    %0 = vector.load %arg1[%c0, %c0_0] : memref<64x16xf32, #tpu.memory_space<vmem>>, vector<64x16xf32>
    %c0_1 = arith.constant 0 : index
    %c0_2 = arith.constant 0 : index
    %1 = vector.load %arg2[%c0_1, %c0_2] : memref<16x32xf32, #tpu.memory_space<vmem>>, vector<16x32xf32>
    %cst = arith.constant dense<0.000000e+00> : vector<64x32xf32>
    %2 = tpu.matmul %0, %1, %cst {dimension_numbers = #tpu.dot_dimension_numbers<[1], [0], [0], [1], [0, 0, 1, 1], [], []>} : vector<64x16xf32>, vector<16x32xf32>, vector<64x32xf32> -> vector<64x32xf32>
    %c0_3 = arith.constant 0 : index
    %c0_4 = arith.constant 0 : index
    %3 = vector.load %arg3[%c0_3, %c0_4] : memref<1x32xf32, #tpu.memory_space<vmem>>, vector<1x32xf32>
    %4 = vector.broadcast %3 : vector<1x32xf32> to vector<64x32xf32>
    %5 = arith.addf %2, %4 : vector<64x32xf32>
    %cst_5 = arith.constant 0.000000e+00 : f32
    %6 = vector.broadcast %cst_5 : f32 to vector<64x32xf32>
    %7 = arith.maximumf %5, %6 : vector<64x32xf32>
    %c0_6 = arith.constant 0 : index
    %c0_7 = arith.constant 0 : index
    %8 = vector.load %arg4[%c0_6, %c0_7] : memref<32x32xf32, #tpu.memory_space<vmem>>, vector<32x32xf32>
    %cst_8 = arith.constant dense<0.000000e+00> : vector<64x32xf32>
    %9 = tpu.matmul %7, %8, %cst_8 {dimension_numbers = #tpu.dot_dimension_numbers<[1], [0], [0], [1], [0, 0, 1, 1], [], []>} : vector<64x32xf32>, vector<32x32xf32>, vector<64x32xf32> -> vector<64x32xf32>
    %c0_9 = arith.constant 0 : index
    %c0_10 = arith.constant 0 : index
    %10 = vector.load %arg5[%c0_9, %c0_10] : memref<1x32xf32, #tpu.memory_space<vmem>>, vector<1x32xf32>
    %11 = vector.broadcast %10 : vector<1x32xf32> to vector<64x32xf32>
    %12 = arith.addf %9, %11 : vector<64x32xf32>
    %c0_11 = arith.constant 0 : index
    %c0_12 = arith.constant 0 : index
    %13 = vector.load %arg6[%c0_11, %c0_12] : memref<64x32xf32, #tpu.memory_space<vmem>>, vector<64x32xf32>
    tpu.vector_store %arg6[%c0_11, %c0_12], %12 {strides = array<i32>} : memref<64x32xf32, #tpu.memory_space<vmem>>, vector<64x32xf32>,
    return
  }
  func.func @transform_0(%arg0: i32) -> (i32, i32) {
    %c0_i32 = arith.constant 0 : i32
    %c0_i32_0 = arith.constant 0 : i32
    return %arg0, %c0_i32 : i32, i32
  }
  func.func @transform_1(%arg0: i32) -> (i32, i32) {
    %c0_i32 = arith.constant 0 : i32
    %c0_i32_0 = arith.constant 0 : i32
    %c0_i32_1 = arith.constant 0 : i32
    return %c0_i32, %c0_i32_0 : i32, i32
  }
  func.func @transform_2(%arg0: i32) -> (i32, i32) {
    %c0_i32 = arith.constant 0 : i32
    %c0_i32_0 = arith.constant 0 : i32
    %c0_i32_1 = arith.constant 0 : i32
    return %c0_i32, %c0_i32_0 : i32, i32
  }
  func.func @transform_3(%arg0: i32) -> (i32, i32) {
    %c0_i32 = arith.constant 0 : i32
    %c0_i32_0 = arith.constant 0 : i32
    %c0_i32_1 = arith.constant 0 : i32
    return %c0_i32, %c0_i32_0 : i32, i32
  }
  func.func @transform_4(%arg0: i32) -> (i32, i32) {
    %c0_i32 = arith.constant 0 : i32
    %c0_i32_0 = arith.constant 0 : i32
    %c0_i32_1 = arith.constant 0 : i32
    return %c0_i32, %c0_i32_0 : i32, i32
  }
  func.func @transform_5(%arg0: i32) -> (i32, i32) {
    %c0_i32 = arith.constant 0 : i32
    %c0_i32_0 = arith.constant 0 : i32
    return %arg0, %c0_i32 : i32, i32
  }
}

</mosaic_0001>

<bundles_post_ra>
// kernel: tpu_custom_call.1
= control target key start
LH: loop header
LB: loop body
LE: loop exit
PB: predicated region body
PF: predicated region fallthrough
CT: control target
= control target key end

     0   :  { %vm37_vm0 = vcmask 130048   ;;  %vm186_vm1 = vcmask 261120   ;;  %s542_s1 = inlined_call_operand.vmem [shape: f32[16,32], index: 1, kind: input, shape index: {}]   ;;  %s543_s0 = inlined_call_operand.vmem [shape: f32[64,16], index: 0, kind: input, shape index: {}]   ;;  %s544_s3 = inlined_call_operand.vmem [shape: f32[32,32], index: 3, kind: input, shape index: {}]   ;;  %s545_s2 = inlined_call_operand.vmem [shape: f32[1,32], index: 2, kind: input, shape index: {}]   ;;  %s546_s4 = inlined_call_operand.vmem [shape: f32[1,32], index: 4, kind: input, shape index: {}]   ;;  %s547_s5 = inlined_call_operand.vmem [shape: f32[64,32], index: 5, kind: output, shape index: {}]  }
   0x1   :  { %v28_v0 = vld [vmem:[%s542_s1] sm:$0xff]  ;;  %v29_v1 = vld [vmem:[%s542_s1 + $0x8] sm:$0xff]  ;;  %v22_v8 = vld [vmem:[%s543_s0 + $0x10] sm:$0xff] }
   0x2   :  { %v20_v2 = vld [vmem:[%s543_s0] sm:$0xff]  ;;  %v404_v3 = vpack.c.bf16 %v29_v1, %v28_v0  ;;  %v176_v5 = vld [vmem:[%s544_s3 + $0x8] sm:$0xff]  ;;  %v23_v9 = vld [vmem:[%s543_s0 + $0x18] sm:$0xff] }
   0x3   :  { %372 = vmatprep.mubr.msk.f32.mxu0 %vm37_vm0, %v20_v2  ;;  %v175_v4 = vld [vmem:[%s544_s3] sm:$0xff]  ;;  %v21_v6 = vld [vmem:[%s543_s0 + $0x8] sm:$0xff]  ;;  %v26_v12 = vld [vmem:[%s543_s0 + $0x30] sm:$0xff] }
   0x4   :  { %405 = vmatprep.subr.bf16.mxu0 %v404_v3  ;;  %v408_v7 = vpack.c.bf16 %v176_v5, %v175_v4  ;;  %v24_v10 = vld [vmem:[%s543_s0 + $0x20] sm:$0xff]  ;;  %v25_v11 = vld [vmem:[%s543_s0 + $0x28] sm:$0xff]  ;;  %v27_v13 = vld [vmem:[%s543_s0 + $0x38] sm:$0xff] }
   0x5   :  { %407 = vmatpush3.bf16.msra.mxu0 %v404_v3  ;;  %v177_v14 = vld [vmem:[%s544_s3 + $0x10] sm:$0xff]  ;;  %v178_v15 = vld [vmem:[%s544_s3 + $0x18] sm:$0xff]  ;;  %v328_v17 = vld [vmem:[%s545_s2] ss:$0 sm:$0xff] }
   0x6   :  { %409 = vmatprep.subr.bf16.mxu1 %v408_v7  ;;  %v412_v16 = vpack.c.bf16 %v178_v15, %v177_v14  ;;  %v337_v42 = vld [vmem:[%s546_s4] ss:$0 sm:$0xff] }
   0x7   :  { %411 = vmatpush3.bf16.msra.mxu1 %v408_v7 }
   0x8   :  { %373 = vmatmul.mubr.msk.f32.vlgmr.msra.gmra.mrb[0].mxu0 %vm37_vm0, %v21_v6  ;;  %413 = vmatprep.subr.bf16.mxu1 %v412_v16 }
   0x9   :  { %375 = vmatprep.mubr.msk.f32.mxu0 %vm37_vm0, %v22_v8 }
   0xb   :  { %415 = vmatpush3.bf16.msra.mxu1 %v412_v16 }
   0xc   :  { %376 = vmatmul.mubr.msk.f32.gmra.mrb[2].mxu0 %vm37_vm0, %v23_v9 }
   0xd   :  { %378 = vmatprep.mubr.msk.f32.mxu0 %vm37_vm0, %v24_v10 }
  0x10   :  { %379 = vmatmul.mubr.msk.f32.gmra.mrb[4].mxu0 %vm37_vm0, %v25_v11 }
  0x11   :  { %381 = vmatprep.mubr.msk.f32.mxu0 %vm37_vm0, %v26_v12 }
  0x14   :  { %382 = vmatmul.mubr.msk.f32.gmra.mrb[6].mxu0 %vm37_vm0, %v27_v13 }
  0xdb   :  { %v374_v18 = vpop.f32.mrb[0].mxu0 }
  0xdc   :  { %v134_v19 = vadd.f32 %v374_v18, %v328_v17  ;;  %v128_v20 = vpop.f32.mrb[1].mxu0 }
  0xdd   :  { %v129_v21 = vadd.f32 %v328_v17, %v128_v20 }
  0xde   :  { %v168_v24 = vmax.f32 %v134_v19, 0.0 }
  0xdf   :  { %v167_v22 = vmax.f32 %v129_v21, 0.0  ;;  %v377_v23 = vpop.f32.mrb[2].mxu0 }
  0xe0   :  { %v144_v25 = vadd.f32 %v377_v23, %v328_v17  ;;  %v138_v26 = vpop.f32.mrb[3].mxu0 }
  0xe1   :  { %v139_v27 = vadd.f32 %v328_v17, %v138_v26  ;;  %392 = vmatprep.mubr.msk.f32.mxu1 %vm186_vm1, %v167_v22 }
  0xe2   :  { %393 = vmatmul.mubr.msk.f32.vlgmr.msra.gmra.mrb[0].mxu1 %vm186_vm1, %v168_v24  ;;  %v170_v30 = vmax.f32 %v144_v25, 0.0 }
  0xe3   :  { %v169_v28 = vmax.f32 %v139_v27, 0.0  ;;  %v380_v29 = vpop.f32.mrb[4].mxu0 }
  0xe4   :  { %v154_v31 = vadd.f32 %v380_v29, %v328_v17  ;;  %v148_v32 = vpop.f32.mrb[5].mxu0 }
  0xe5   :  { %v149_v33 = vadd.f32 %v328_v17, %v148_v32  ;;  %395 = vmatprep.mubr.msk.f32.mxu1 %vm186_vm1, %v169_v28 }
  0xe6   :  { %396 = vmatmul.mubr.msk.f32.gmra.mrb[2].mxu1 %vm186_vm1, %v170_v30  ;;  %v172_v36 = vmax.f32 %v154_v31, 0.0 }
  0xe7   :  { %v171_v34 = vmax.f32 %v149_v33, 0.0  ;;  %v383_v35 = vpop.f32.mrb[6].mxu0 }
  0xe8   :  { %v164_v37 = vadd.f32 %v383_v35, %v328_v17  ;;  %v158_v38 = vpop.f32.mrb[7].mxu0 }
  0xe9   :  { %v159_v39 = vadd.f32 %v328_v17, %v158_v38  ;;  %398 = vmatprep.mubr.msk.f32.mxu1 %vm186_vm1, %v171_v34 }
  0xea   :  { %399 = vmatmul.mubr.msk.f32.gmra.mrb[4].mxu1 %vm186_vm1, %v172_v36  ;;  %v174_v41 = vmax.f32 %v164_v37, 0.0 }
  0xeb   :  { %v173_v40 = vmax.f32 %v159_v39, 0.0 }
  0xed   :  { %401 = vmatprep.mubr.msk.f32.mxu1 %vm186_vm1, %v173_v40 }
  0xee   :  { %402 = vmatmul.mubr.msk.f32.gmra.mrb[6].mxu1 %vm186_vm1, %v174_v41 }
 0x1b5   :  { %v394_v43 = vpop.f32.mrb[0].mxu1 }
 0x1b6   :  { %v283_v44 = vadd.f32 %v394_v43, %v337_v42  ;;  %v277_v45 = vpop.f32.mrb[1].mxu1 }
 0x1b7   :  { %v278_v46 = vadd.f32 %v337_v42, %v277_v45 }
 0x1b8   :  { %317 = vst.msk [vmem:[%s547_s5 + $0x8] sm:$0xff] %vm186_vm1, %v283_v44 }
 0x1b9   :  { %316 = vst.msk [vmem:[%s547_s5] sm:$0xff] %vm186_vm1, %v278_v46  ;;  %v397_v47 = vpop.f32.mrb[2].mxu1 }
 0x1ba   :  { %v293_v48 = vadd.f32 %v397_v47, %v337_v42  ;;  %v287_v49 = vpop.f32.mrb[3].mxu1 }
 0x1bb   :  { %v288_v50 = vadd.f32 %v337_v42, %v287_v49 }
 0x1bc   :  { %319 = vst.msk [vmem:[%s547_s5 + $0x18] sm:$0xff] %vm186_vm1, %v293_v48 }
 0x1bd   :  { %318 = vst.msk [vmem:[%s547_s5 + $0x10] sm:$0xff] %vm186_vm1, %v288_v50  ;;  %v400_v51 = vpop.f32.mrb[4].mxu1 }
 0x1be   :  { %v303_v52 = vadd.f32 %v400_v51, %v337_v42  ;;  %v297_v53 = vpop.f32.mrb[5].mxu1 }
 0x1bf   :  { %v298_v54 = vadd.f32 %v337_v42, %v297_v53 }
 0x1c0   :  { %321 = vst.msk [vmem:[%s547_s5 + $0x28] sm:$0xff] %vm186_vm1, %v303_v52 }
 0x1c1   :  { %320 = vst.msk [vmem:[%s547_s5 + $0x20] sm:$0xff] %vm186_vm1, %v298_v54  ;;  %v403_v55 = vpop.f32.mrb[6].mxu1 }
 0x1c2   :  { %v313_v56 = vadd.f32 %v403_v55, %v337_v42  ;;  %v307_v57 = vpop.f32.mrb[7].mxu1 }
 0x1c3   :  { %v308_v58 = vadd.f32 %v337_v42, %v307_v57 }
 0x1c4   :  { %323 = vst.msk [vmem:[%s547_s5 + $0x38] sm:$0xff] %vm186_vm1, %v313_v56 }
 0x1c5   :  { %322 = vst.msk [vmem:[%s547_s5 + $0x30] sm:$0xff] %vm186_vm1, %v308_v58 }

</bundles_post_ra>
